<compile_context>
chip_gen: v6e
topology: v6e:2x2x1
jax: 0.10.0
libtpu: 0.0.40
codegen_flags: <defaults>
</compile_context>

<pallas_src>
import functools

import jax
import jax.numpy as jnp
import numpy as np
from jax.experimental import pallas as pl
from jax.experimental.pallas import tpu as pltpu

_LANE = 128


# --------------------------------------------------------------------------
# VMEM budgeting helpers (generation-aware).
# --------------------------------------------------------------------------
def _vmem_caps():
    """Return (physical VMEM per core, conservative working budget) in bytes."""
    try:
        cap = int(pltpu.get_tpu_info().vmem_capacity_bytes)
    except Exception:
        cap = 64 << 20                      # conservative fallback (v7x-sized)
    budget = min(int(cap * 0.75), cap - (12 << 20))   # ~48 MiB v7x / ~96 MiB v5e,v6e
    return cap, budget


def _compiler_params(dimension_semantics, footprint_bytes, cap_bytes):
    """Explicit scoped-VMEM limit derived from the real tile footprint."""
    limit = max(int(footprint_bytes) + (4 << 20), 32 << 20)   # +headroom for scratch
    limit = min(limit, cap_bytes - (2 << 20))
    return pltpu.CompilerParams(
        dimension_semantics=dimension_semantics,
        vmem_limit_bytes=int(limit),
    )


def _sigmoid(s):
    # exp on the EUP; approx reciprocal also on the EUP -> leaves VPU slots free.
    return pl.reciprocal(1.0 + jnp.exp(-s), approx=True)


# --------------------------------------------------------------------------
# Kernels.
# --------------------------------------------------------------------------
def _se_fused_kernel(x_ref, w1t_ref, w2t_ref, o_ref, *, inv_t):
    """Single fused pass: squeeze + MLP + sigmoid + excite for one batch tile.

    x_ref   : VMEM (Bt, C, Tp)   input activations (any float dtype)
    w1t_ref : VMEM (C, C_r)      fc1 weight, pre-transposed, f32
    w2t_ref : VMEM (C_r, C)      fc2 weight, pre-transposed, f32
    o_ref   : VMEM (Bt, C, Tp)   gated output
    """
    # Squeeze: mean over (zero-padded) time, f32 accumulation.
    y = jnp.sum(x_ref[...], axis=-1, dtype=jnp.float32) * inv_t          # (Bt, C)

    # Bottleneck MLP (tiny; hidden filler in an HBM-bound kernel).
    h = jnp.maximum(
        jnp.dot(y, w1t_ref[...], preferred_element_type=jnp.float32), 0.0)
    s = _sigmoid(jnp.dot(h, w2t_ref[...], preferred_element_type=jnp.float32))

    # Excite: re-read x_ref (do not keep the multi-MiB tile live across the MLP).
    gate = s.astype(o_ref.dtype)[:, :, None]                              # (Bt, C, 1)
    o_ref[...] = x_ref[...].astype(o_ref.dtype) * gate


def _se_gate_kernel(x_ref, w1t_ref, w2t_ref, g_ref, *, inv_t):
    """Pass 1 of the two-pass fallback: per-(b, c) gate, T is the reduction axis.

    grid = (num_batch_tiles, num_time_tiles); time is innermost ("arbitrary").
    g_ref : VMEM (Bt, C, 1) f32 -- used as the running-sum accumulator and
            overwritten with the sigmoid gate on the last time step.
    """
    t = pl.program_id(1)

    @pl.when(t == 0)
    def _():
        g_ref[...] = jnp.zeros_like(g_ref)

    g_ref[...] += jnp.sum(x_ref[...], axis=-1, keepdims=True, dtype=jnp.float32)

    @pl.when(t == pl.num_programs(1) - 1)
    def _():
        y = g_ref[...][:, :, 0] * inv_t                                   # (Bt, C)
        h = jnp.maximum(
            jnp.dot(y, w1t_ref[...], preferred_element_type=jnp.float32), 0.0)
        s = _sigmoid(jnp.dot(h, w2t_ref[...], preferred_element_type=jnp.float32))
        g_ref[...] = s[:, :, None]


def _se_excite_kernel(x_ref, g_ref, o_ref):
    """Pass 2 of the two-pass fallback: out = x * gate, tiled over (B, T)."""
    gate = g_ref[...].astype(o_ref.dtype)                                 # (Bt, C, 1)
    o_ref[...] = x_ref[...].astype(o_ref.dtype) * gate


# --------------------------------------------------------------------------
# Wrapper.
# --------------------------------------------------------------------------
def squeeze_excite(x, fc1_weight, fc2_weight, *, force_two_pass=False):
    """Pallas implementation of SqueezeExcite.forward (global context).

    x          : (B, C, T) float32 or bfloat16
    fc1_weight : (C_r, C)  (PyTorch nn.Linear layout, bias=False)
    fc2_weight : (C, C_r)  (PyTorch nn.Linear layout, bias=False)
    returns      (B, C, T), same dtype as x
    """
    B, C, T = x.shape
    C_r = fc1_weight.shape[0]
    assert fc1_weight.shape == (C_r, C)
    assert fc2_weight.shape == (C, C_r)

    out_dtype = x.dtype
    in_item = x.dtype.itemsize
    out_item = jnp.dtype(out_dtype).itemsize

    # Pre-transpose the tiny FC weights once (no in-kernel transposes); keep f32.
    w1t = fc1_weight.astype(jnp.float32).T          # (C, C_r)
    w2t = fc2_weight.astype(jnp.float32).T          # (C_r, C)
    weight_bytes = 2 * 4 * (w1t.size + w2t.size)    # resident, double-buffered

    cap, budget = _vmem_caps()
    inv_t = 1.0 / T                                  # mean uses the *real* T
    t_pad = pl.cdiv(T, _LANE) * _LANE                # lane-dense stores

    # -------------------- fused single-pass path --------------------------
    # Per-batch-element footprint: in tile + out tile, each double-buffered.
    plane_bytes = C * t_pad * (in_item + out_item) * 2
    if (not force_two_pass) and plane_bytes + weight_bytes <= budget:
        batch_tile = max(1, min(B, (budget - weight_bytes) // plane_bytes))
        if B > 1:
            # Guarantee >= 2 grid steps so both v7x TensorCores get work.
            batch_tile = min(batch_tile, pl.cdiv(B, 2))
        grid = (pl.cdiv(B, batch_tile),)
        if t_pad != T:
            x = jnp.pad(x, ((0, 0), (0, 0), (0, t_pad - T)))  # zeros keep mean exact
        footprint = batch_tile * plane_bytes + weight_bytes

        # NOTE: when B % batch_tile != 0 the last block reads padded/garbage batch
        # rows; their gates are garbage but the masked writeback discards them.
        out = pl.pallas_call(
            functools.partial(_se_fused_kernel, inv_t=inv_t),
            out_shape=jax.ShapeDtypeStruct((B, C, t_pad), out_dtype),
            grid_spec=pltpu.PrefetchScalarGridSpec(
                num_scalar_prefetch=0,
                grid=grid,
                in_specs=[
                    pl.BlockSpec((batch_tile, C, t_pad), lambda b: (b, 0, 0)),
                    pl.BlockSpec((C, C_r), lambda b: (0, 0)),
                    pl.BlockSpec((C_r, C), lambda b: (0, 0)),
                ],
                out_specs=pl.BlockSpec((batch_tile, C, t_pad), lambda b: (b, 0, 0)),
            ),
            compiler_params=_compiler_params(("parallel",), footprint, cap),
            # Callers that donate x can additionally pass
            # input_output_aliases={0: 0} to avoid a second (B, C, T) HBM buffer.
        )(x, w1t, w2t)
        return out[..., :T] if t_pad != T else out

    # -------------------- two-pass fallback (large C*T) -------------------
    # Pass 1: gate (mean over T-tiles + MLP + sigmoid) -> (B, C, 1) f32.
    # Pass 2: excite, tiled over (B, T).  Costs +50% HBM reads but always fits.
    per_bt128 = C * _LANE * (in_item + out_item) * 2     # (1, C, 128) excite step
    time_tile = max(_LANE, ((budget - weight_bytes) // max(1, per_bt128)) * _LANE)
    time_tile = min(time_tile, t_pad)
    time_tile = (time_tile // _LANE) * _LANE
    # Pad T to a multiple of time_tile with zeros: every T block is fully real
    # or zero, so the reduction never sees OOB garbage.
    t_pad2 = pl.cdiv(T, time_tile) * time_tile
    if t_pad2 != T:
        x = jnp.pad(x, ((0, 0), (0, 0), (0, t_pad2 - T)))

    per_b = C * time_tile * (in_item + out_item) * 2
    batch_tile = max(1, min(B, (budget - weight_bytes) // max(1, per_b)))
    if B > 1:
        batch_tile = min(batch_tile, pl.cdiv(B, 2))
    nb = pl.cdiv(B, batch_tile)
    nt = t_pad2 // time_tile
    gate_lane_bytes = batch_tile * C * _LANE * 4 * 2     # (Bt, C, 1) padded to a lane

    gate_footprint = (batch_tile * C * time_tile * in_item * 2
                      + gate_lane_bytes + weight_bytes)
    gate = pl.pallas_call(
        functools.partial(_se_gate_kernel, inv_t=inv_t),
        out_shape=jax.ShapeDtypeStruct((B, C, 1), jnp.float32),
        grid_spec=pltpu.PrefetchScalarGridSpec(
            num_scalar_prefetch=0,
            grid=(nb, nt),
            in_specs=[
                pl.BlockSpec((batch_tile, C, time_tile), lambda b, t: (b, 0, t)),
                pl.BlockSpec((C, C_r), lambda b, t: (0, 0)),
                pl.BlockSpec((C_r, C), lambda b, t: (0, 0)),
            ],
            out_specs=pl.BlockSpec((batch_tile, C, 1), lambda b, t: (b, 0, 0)),
        ),
        compiler_params=_compiler_params(("parallel", "arbitrary"),
                                         gate_footprint, cap),
    )(x, w1t, w2t)

    excite_footprint = (batch_tile * C * time_tile * (in_item + out_item) * 2
                        + gate_lane_bytes)
    out = pl.pallas_call(
        _se_excite_kernel,
        out_shape=jax.ShapeDtypeStruct((B, C, t_pad2), out_dtype),
        grid_spec=pltpu.PrefetchScalarGridSpec(
            num_scalar_prefetch=0,
            grid=(nb, nt),
            in_specs=[
                pl.BlockSpec((batch_tile, C, time_tile), lambda b, t: (b, 0, t)),
                pl.BlockSpec((batch_tile, C, 1), lambda b, t: (b, 0, 0)),
            ],
            out_specs=pl.BlockSpec((batch_tile, C, time_tile), lambda b, t: (b, 0, t)),
        ),
        compiler_params=_compiler_params(("parallel", "parallel"),
                                         excite_footprint, cap),
    )(x, gate)
    return out[..., :T] if t_pad2 != T else out


# --------------------------------------------------------------------------
# Pure-JAX reference (mirrors the PyTorch forward, context_window <= 0).
# --------------------------------------------------------------------------
def _reference(x, fc1_weight, fc2_weight):
    xf = x.astype(jnp.float32)
    y = jnp.mean(xf, axis=-1)                             # AdaptiveAvgPool1d(1)
    h = jnp.maximum(y @ fc1_weight.astype(jnp.float32).T, 0.0)
    s = jax.nn.sigmoid(h @ fc2_weight.astype(jnp.float32).T)
    return xf * s[:, :, None]


if __name__ == "__main__":
    # Module config: channels=16, reduction_ratio=4, context_window=-1 (global).
    B, C, reduction_ratio, T = 2, 16, 4, 128
    C_r = C // reduction_ratio

    key = jax.random.PRNGKey(0)
    kx, k1, k2 = jax.random.split(key, 3)
    x = jax.random.normal(kx, (B, C, T), dtype=jnp.float32)
    fc1_weight = jax.random.normal(k1, (C_r, C), dtype=jnp.float32) / np.sqrt(C)
    fc2_weight = jax.random.normal(k2, (C, C_r), dtype=jnp.float32) / np.sqrt(C_r)

    ref = _reference(x, fc1_weight, fc2_weight)

    # 1) fused single-pass path (f32, lane-aligned T).
    out = jax.block_until_ready(squeeze_excite(x, fc1_weight, fc2_weight))
    assert out.shape == ref.shape and out.dtype == x.dtype
    np.testing.assert_allclose(np.asarray(out), np.asarray(ref),
                               atol=1e-2, rtol=1e-2)

    # 2) two-pass fallback path (gate pass + excite pass), forced at small shapes.
    out2 = jax.block_until_ready(
        squeeze_excite(x, fc1_weight, fc2_weight, force_two_pass=True))
    np.testing.assert_allclose(np.asarray(out2), np.asarray(ref),
                               atol=1e-2, rtol=1e-2)

    # 3) bf16 I/O with a non-lane-aligned T (exercises the pad/slice wrapper).
    T3 = 200
    x3 = jax.random.normal(kx, (B, C, T3), dtype=jnp.float32).astype(jnp.bfloat16)
    ref3 = _reference(x3.astype(jnp.float32), fc1_weight, fc2_weight)
    out3 = jax.block_until_ready(squeeze_excite(x3, fc1_weight, fc2_weight))
    assert out3.shape == (B, C, T3) and out3.dtype == jnp.bfloat16
    np.testing.assert_allclose(np.asarray(out3.astype(jnp.float32)),
                               np.asarray(ref3), atol=5e-2, rtol=5e-2)

    print("KERNEL_OK")
</pallas_src>

<mosaic_0001>
module attributes {stable_mosaic.version = 11 : i64} {
  func.func @_se_fused_kernel(%arg0: i32, %arg1: memref<1x16x128xf32, #tpu.memory_space<vmem>>, %arg2: memref<16x4xf32, #tpu.memory_space<vmem>>, %arg3: memref<4x16xf32, #tpu.memory_space<vmem>>, %arg4: memref<1x16x128xf32, #tpu.memory_space<vmem>>) attributes {dimension_semantics = [#tpu.dimension_semantics<parallel>], iteration_bounds = array<i64: 2>, scalar_prefetch = 0 : i64, scratch_operands = 0 : i64, tpu.core_type = #tpu.core_type<tc>, window_params = [{transform_indices = @transform_0, window_bounds = array<i64: 1, 16, 128>}, {pipeline_mode = #tpu.pipeline_mode<synchronous>, transform_indices = @transform_1, window_bounds = array<i64: 16, 4>}, {pipeline_mode = #tpu.pipeline_mode<synchronous>, transform_indices = @transform_2, window_bounds = array<i64: 4, 16>}, {transform_indices = @transform_3, window_bounds = array<i64: 1, 16, 128>}]} {
    %c0 = arith.constant 0 : index
    %c0_0 = arith.constant 0 : index
    %c0_1 = arith.constant 0 : index
    %0 = vector.load %arg1[%c0, %c0_0, %c0_1] : memref<1x16x128xf32, #tpu.memory_space<vmem>>, vector<1x16x128xf32>
    %cst = arith.constant dense<0.000000e+00> : vector<1x16xf32>
    %1 = vector.multi_reduction <add>, %0, %cst [2] : vector<1x16x128xf32> to vector<1x16xf32>
    %cst_2 = arith.constant 7.812500e-03 : f32
    %2 = vector.broadcast %cst_2 : f32 to vector<1x16xf32>
    %3 = arith.mulf %1, %2 : vector<1x16xf32>
    %c0_3 = arith.constant 0 : index
    %c0_4 = arith.constant 0 : index
    %4 = vector.load %arg2[%c0_3, %c0_4] : memref<16x4xf32, #tpu.memory_space<vmem>>, vector<16x4xf32>
    %cst_5 = arith.constant dense<0.000000e+00> : vector<1x4xf32>
    %5 = tpu.matmul %3, %4, %cst_5 {dimension_numbers = #tpu.dot_dimension_numbers<[1], [0], [0], [1], [0, 0, 1, 1], [], []>} : vector<1x16xf32>, vector<16x4xf32>, vector<1x4xf32> -> vector<1x4xf32>
    %cst_6 = arith.constant 0.000000e+00 : f32
    %6 = vector.broadcast %cst_6 : f32 to vector<1x4xf32>
    %7 = arith.maximumf %5, %6 : vector<1x4xf32>
    %c0_7 = arith.constant 0 : index
    %c0_8 = arith.constant 0 : index
    %8 = vector.load %arg3[%c0_7, %c0_8] : memref<4x16xf32, #tpu.memory_space<vmem>>, vector<4x16xf32>
    %cst_9 = arith.constant dense<0.000000e+00> : vector<1x16xf32>
    %9 = tpu.matmul %7, %8, %cst_9 {dimension_numbers = #tpu.dot_dimension_numbers<[1], [0], [0], [1], [0, 0, 1, 1], [], []>} : vector<1x4xf32>, vector<4x16xf32>, vector<1x16xf32> -> vector<1x16xf32>
    %cst_10 = arith.constant 0.000000e+00 : f32
    %10 = vector.broadcast %cst_10 : f32 to vector<1x16xf32>
    %11 = arith.subf %10, %9 : vector<1x16xf32>
    %12 = math.exp %11 : vector<1x16xf32>
    %cst_11 = arith.constant 1.000000e+00 : f32
    %13 = vector.broadcast %cst_11 : f32 to vector<1x16xf32>
    %14 = arith.addf %13, %12 : vector<1x16xf32>
    %15 = tpu.reciprocal %14 {approx = true} : vector<1x16xf32> -> vector<1x16xf32>
    %16 = vector.shape_cast %15 : vector<1x16xf32> to vector<1x16x1xf32>
    %c0_12 = arith.constant 0 : index
    %c0_13 = arith.constant 0 : index
    %c0_14 = arith.constant 0 : index
    %17 = vector.load %arg1[%c0_12, %c0_13, %c0_14] : memref<1x16x128xf32, #tpu.memory_space<vmem>>, vector<1x16x128xf32>
    %18 = vector.broadcast %16 : vector<1x16x1xf32> to vector<1x16x128xf32>
    %19 = arith.mulf %17, %18 : vector<1x16x128xf32>
    %c0_15 = arith.constant 0 : index
    %c0_16 = arith.constant 0 : index
    %c0_17 = arith.constant 0 : index
    %20 = vector.load %arg4[%c0_15, %c0_16, %c0_17] : memref<1x16x128xf32, #tpu.memory_space<vmem>>, vector<1x16x128xf32>
    tpu.vector_store %arg4[%c0_15, %c0_16, %c0_17], %19 {strides = array<i32>} : memref<1x16x128xf32, #tpu.memory_space<vmem>>, vector<1x16x128xf32>,
    return
  }
  func.func @transform_0(%arg0: i32) -> (i32, i32, i32) {
    %c0_i32 = arith.constant 0 : i32
    %c0_i32_0 = arith.constant 0 : i32
    %c0_i32_1 = arith.constant 0 : i32
    return %arg0, %c0_i32, %c0_i32_0 : i32, i32, i32
  }
  func.func @transform_1(%arg0: i32) -> (i32, i32) {
    %c0_i32 = arith.constant 0 : i32
    %c0_i32_0 = arith.constant 0 : i32
    %c0_i32_1 = arith.constant 0 : i32
    return %c0_i32, %c0_i32_0 : i32, i32
  }
  func.func @transform_2(%arg0: i32) -> (i32, i32) {
    %c0_i32 = arith.constant 0 : i32
    %c0_i32_0 = arith.constant 0 : i32
    %c0_i32_1 = arith.constant 0 : i32
    return %c0_i32, %c0_i32_0 : i32, i32
  }
  func.func @transform_3(%arg0: i32) -> (i32, i32, i32) {
    %c0_i32 = arith.constant 0 : i32
    %c0_i32_0 = arith.constant 0 : i32
    %c0_i32_1 = arith.constant 0 : i32
    return %arg0, %c0_i32, %c0_i32_0 : i32, i32, i32
  }
}

</mosaic_0001>

<bundles_post_ra>
// kernel: tpu_custom_call.1
= control target key start
LH: loop header
LB: loop body
LE: loop exit
PB: predicated region body
PF: predicated region fallthrough
CT: control target
= control target key end

     0   :  { %8 = vsyncpa [#allocation3], 0  ;;  %s855_s0 = inlined_call_operand.hbm [shape: f32[2,16,128], index: 0, kind: input, shape index: {}]   ;;  %s856_s1 = inlined_call_operand.vmem [shape: f32[16,4], index: 1, kind: input, shape index: {}]   ;;  %s857_s2 = inlined_call_operand.vmem [shape: f32[4,16], index: 2, kind: input, shape index: {}]   ;;  %s858_s3 = inlined_call_operand.hbm [shape: f32[2,16,128], index: 3, kind: output, shape index: {}]  }
   0x1   :  { %10 = vsyncpa [#allocation3 + $0x1], 0 }
   0x2   :  { %11 = vsyncpa [#allocation4], 0 }
   0x3   :  { %13 = vsyncpa [#allocation4 + $0x1], 0  ;;  %s688_s12 = smov 0   ;;  %s690_s13 = smov 0  }
   0x4   :  { %s692_s14 = smov 0   ;;  %s694_s15 = smov 0  }
   0x5 LB: > { %s709_s16 = sadd.s32 4294967295, %s658_s15   ;;  %s474_s17 = sadd.s32 4294967294, %s658_s15   ;;  %s658_s15 = sphi %s694_s15, %s873_s15   ;;  %s654_s14 = sphi %s692_s14, %s872_s14   ;;  %s650_s13 = sphi %s690_s13, %s871_s13   ;;  %s646_s12 = sphi %s688_s12, %s870_s12  }
   0x6   : > { %s713_s18 = sadd.s32 1, %s658_s15   ;;  %s26_s19 = sadd.s32 1, %s654_s14 }
   0x7   : > { %s23_s20 = ssub.s32 %s658_s15, %s713_s18  ;;  %p33_p0 = scmp.ne.s32.totalorder %s654_s14, %s650_s13 }
   0x8   : > { %p24_p1 = scmp.eq.s32.totalorder %s23_s20, 0  ;;  %p34_p2 = scmp.eq.s32.totalorder %s658_s15, 0 }
   0x9   : > { %p39_p3 = scmp.ne.s32.totalorder %s650_s13, %s646_s12  ;;  %p40_p4 = scmp.eq.s32.totalorder %s709_s16, 0 }
   0xa   : > { %s725_s21 = scalar_select %p24_p1, %s654_s14, %s26_s19  }
   0xb   : > { %p727_p5 = por %p34_p2, %p33_p0  ;;  %p731_p6 = por %p40_p4, %p39_p3 }
   0xc   : > { %p105_p7 = scmp.eq.s32.totalorder %s709_s16, 1  ;;  %p111_p8 = scmp.eq.s32.totalorder %s474_s17, 1 }
   0xd   : > { %s862_s23 = scalar_select %p731_p6, 1, 0 }
   0xe   : > { %p522_p10 = scmp.lt.s32.totalorder %s658_s15, 2  ;;  %p738_p11 = por %p105_p7, %p33_p0 }
   0xf   : > { %p742_p12 = por %p111_p8, %p39_p3  ;;  %s137_s26 = sand.u32 1, %s654_s14  }
  0x10   : > { %s863_s24 = scalar_select %p738_p11, 1, 0 }
  0x11   : > { %s864_s25 = scalar_select %p742_p12, 1, 0 }
  0x12   : > { %s491_s27 = sshll.u32 %s658_s15, 8  ;;  %s477_s28 = sshll.u32 %s137_s26, 4 }
  0x13   : > { %s751_s4 = scalar_lea.hbm %s855_s0, %s491_s27  ;;  %s141_s5 = scalar_lea.vmem [#allocation2], %s477_s28 }
  0x14   : > { %s148_s6 = sshll.u32 %s141_s5, 4  ;;  %p755_p13 = pnand %p522_p10, %p727_p5  ;;  %s759_s6 = int_to_ptr.vmem [resolvable:$true] %s148_s6 }
  0x15   : > { %s761_s8 = scalar_lea.sflag [#allocation3], %s137_s26  ;;  %s566_s9 = scalar_lea.hbm %s751_s4, 256 }
  0x16   : > { %p567_p0 = scmp.ne.s32.totalorder %s751_s4, %s566_s9  ;;  %p568_p1 = pneg %p755_p13 }
  0x17   : > { %s571_s17 = scalar_lea.hbm %s855_s0, 512  ;;  %p572_p4 = scmp.lt.s32.totalorder %s751_s4, %s855_s0 }
  0x18   : > { %p569_p2 = pnand %p568_p1, %p567_p0  ;;  %p573_p5 = scmp.lt.s32.totalorder %s571_s17, %s566_s9 }
  0x1a   : > { %p570_p3 = pneg %p569_p2  ;;  %p574_p7 = por %p573_p5, %p572_p4 }
  0x1c   : > { %p575_p8 = pnand %p574_p7, %p570_p3 }
  0x1e   : > { %578 = shalt.err (!%p575_p8)
}
  0x1f   : > { %s579_s22 = scalar_lea.vmem %s759_s6, 256  ;;  %s660_s26 = smov [#allocation2]  }
  0x20   : > { %p580_p10 = scmp.ne.s32.totalorder %s759_s6, %s579_s22  ;;  %s584_s27 = sshll.u32 %s660_s26, 4  ;;  %s585_s27 = int_to_ptr.vmem [resolvable:$false] %s584_s27 }
  0x21   : > { %s586_s28 = scalar_lea.vmem %s585_s27, 512  ;;  %p587_p2 = scmp.lt.s32.totalorder %s759_s6, %s585_s27 }
  0x22   : > { %p582_p9 = pnand %p580_p10, %p568_p1  ;;  %p588_p12 = scmp.lt.s32.totalorder %s586_s28, %s579_s22 }
  0x24   : > { %p583_p0 = pneg %p582_p9  ;;  %p589_p11 = por %p588_p12, %p587_p2 }
  0x26   : > { %p590_p6 = pnand %p589_p11, %p583_p0 }
  0x28   : > { %593 = shalt.err (!%p590_p6)
}
  0x29   : > { %s661_s29 = smov 128   ;;  %s662_s30 = smov 8  }
  0x2a   : > { %517 = dma.hbm_to_vmem [thread:$0]  (!%p755_p13), %s751_s4, 256, %s759_s6, %s761_s8, %s661_s29, %s661_s29, %s662_s30  }
  0x2b   : > { %p480_p9 = scmp.ge.s32.totalorder %s658_s15, 1  ;;  %p156_p1 = scmp.lt.s32.totalorder %s658_s15, 3 }
  0x2d   : > { %p157_p3 = pnand %p480_p9, %p156_p1 }
  0x2e   : > { %s785_s5 = sand.u32 (!%p157_p3), 1, %s650_s13   ;;  %p866_p6 = scmp.ne.s32.totalorder (!%p157_p3), %s862_s23, 0 }
  0x2f   : > { %160 = sbr.rel (%p157_p3) target bundleno = 760 (0x2f8), region = 32  ;;  %s481_s9 = sshll.u32 (!%p157_p3), %s785_s5, 4 }
  0x30   : > { %s163_s10 = scalar_lea.sflag (!%p157_p3), [#allocation3], %s785_s5  ;;  %s166_s11 = scalar_lea.vmem (!%p157_p3), [#allocation2], %s481_s9 }
  0x34   : > { %637 = dma.done.wait (%p866_p6), %s163_s10, 256  }
  0x35   : > { %639 = vsyncadd (%p866_p6), %s163_s10, 4294967040  ;;  %v189_v0 = vld [vmem:[%s166_s11] sm:$0xff]  ;;  %v190_v1 = vld [vmem:[%s166_s11 + $0x8] sm:$0xff]  ;;  %v663_v2 = vmov 0.0   ;;  %vm664_vm0 = vmmov 0   ;;  %v201_v5 = vlaneseq  ;;  %vm212_vm1 = vcmask 130112  }
  0x36   : > { %191 = vadd.xlane.f32.xlu0 %v189_v0  ;;  %498 = vmatprep.subr.mxu0 %v663_v2  ;;  %v198_v3 = vld [vmem:[%s856_s1 + $0x8] sm:$0xff]  ;;  %v197_v4 = vld [vmem:[%s856_s1] sm:$0xff]  ;;  %vm214_vm2 = vcmask 130048   ;;  %vm293_vm3 = vcmask 1043456   ;;  %vm289_vm4 = vcmask 31744   ;;  %s188_s19 = scalar_lea.vmem [#allocation5], %s481_s9 }
  0x37   : > { %505 = vmatprep.subr.mxu1 %v663_v2  ;;  %499 = vmatpush3.msra.mxu0 %v198_v3  ;;  %v202_v6 = vand.u32 127, %v201_v5  ;;  %v204_v7 = vshrl.u32 %v201_v5, 7  ;;  %v288_v18 = vld [vmem:[%s857_s2] sm:$0xf]  ;;  %s401_s20 = sshll.u32 %s188_s19, 4  ;;  %s492_s22 = sshll.u32 %s709_s16, 8  ;;  %s807_s20 = int_to_ptr.vmem [resolvable:$true] %s401_s20 }
  0x38   : > { %500 = vmatprep.subr.mxu0 %v663_v2  ;;  %502 = vmatprep.mubr.msk.f32.mxu0 %vm664_vm0, %v663_v2  ;;  %s812_s28 = scalar_lea.hbm %s858_s3, %s492_s22  ;;  %s388_s29 = scalar_lea.sflag [#allocation4], %s785_s5 }
  0x39   : > { %501 = vmatpush3.msra.mxu0 %v197_v4  ;;  %507 = vmatprep.mubr.msk.f32.mxu1 %vm664_vm0, %v663_v2  ;;  %v207_v8 = vadd.s32 4294967288, %v202_v6  ;;  %v205_v10 = vsub.s32 %v202_v6, %v204_v7  ;;  %v374_v28 = vsub.s32 0, %v204_v7  ;;  %s594_s30 = scalar_lea.vmem %s807_s20, 256  ;;  %p867_p12 = scmp.ne.s32.totalorder %s863_s24, 0 }
  0x3a   : > { %193 = vadd.xlane.f32.xlu0 %v190_v1  ;;  %506 = vmatpush3.msk.msra.mxu1 %vm293_vm3, %v288_v18  ;;  %p595_p11 = scmp.ne.s32.totalorder %s807_s20, %s594_s30  ;;  %s665_s16 = smov [#allocation5]  }
  0x3b   : > { %v210_v12 = vsub.s32 %v207_v8, %v204_v7  ;;  %s598_s9 = sshll.u32 %s665_s16, 4  ;;  %s599_s9 = int_to_ptr.vmem [resolvable:$false] %s598_s9 }
  0x3c   : > { %p596_p13 = pnand %p595_p11, %p867_p12  ;;  %s600_s10 = scalar_lea.vmem %s599_s9, 512 }
  0x3d   : > { %p601_p5 = scmp.lt.s32.totalorder %s807_s20, %s599_s9  ;;  %p602_p7 = scmp.lt.s32.totalorder %s600_s10, %s594_s30 }
  0x3e   : > { %p597_p4 = pneg %p596_p13 }
  0x3f   : > { %p603_p8 = por %p602_p7, %p601_p5 }
  0x41   : > { %p604_p10 = pnand %p603_p8, %p597_p4 }
  0xbf   : > { %v192_v9 = vpop.xlane.xlu0 %191 }
  0xc0   : > { %v195_v11 = vmul.f32 0.0078125, %v192_v9 }
  0xc2   : > { %v206_v15 = vrot.slane %v195_v11, %v205_v10 }
  0xc3   : > { %v194_v13 = vpop.xlane.xlu0 %193 }
  0xc4   : > { %v196_v14 = vmul.f32 0.0078125, %v194_v13 }
  0xc6   : > { %v211_v16 = vrot.slane %v196_v14, %v210_v12 }
  0xc8   : > { %v213_v17 = vsel %vm212_vm1, %v211_v16, %v206_v15 }
  0xc9   : > { %503 = vmatmul.mubr.msk.f32.vlgmr.msra.gmra.mxu0 %vm214_vm2, %v213_v17 }
 0x189   : > { %v283_v19 = vpop.f32.mrf.mxu0 }
 0x18a   : > { %v287_v20 = vmax.f32 %v283_v19, 0.0 }
 0x18b   : > { %v504_v21 = vpop.f32.mrf.mxu0 }
 0x18c   : > { %508 = vmatmul.mubr.msk.f32.vlgmr.msra.gmra.mxu1 %vm289_vm4, %v287_v20 }
 0x24c   : > { %v363_v22 = vpop.f32.mrf.mxu1 }
 0x24d   : > { %v367_v23 = vsub.f32 0.0, %v363_v22 }
 0x24e   : > { %v509_v24 = vpop.f32.mrf.mxu1 }
 0x24f   : > { %v368_v25 = vmul.f32 1.442695, %v367_v23 }
 0x251   : > { %562 = vpow2.f32 %v368_v25 }
 0x25e   : > { %v563_v26 = vpop.eup %562 }
 0x25f   : > { %v370_v27 = vadd.f32 1.0, %v563_v26 }
 0x261   : > { %564 = vrcp.f32 %v370_v27 }
 0x26e   : > { %v565_v29 = vpop.eup %564 }
 0x26f   : > { %v375_v30 = vrot.slane %v565_v29, %v374_v28 }
 0x271   : > { %377 = vbcast.lane.b32.xlu1 %v375_v30, 256 }
 0x275   : > { %381 = vbcast.lane.b32.xlu1 %v375_v30, 264 }
 0x2e3   : > { %v378_v31 = vpop.permute.xlu1 %377 }
 0x2e4   : > { %v383_v32 = vmul.f32 %v378_v31, %v189_v0 }
 0x2e6   : > { %385 = vst [vmem:[%s188_s19] sm:$0xff] %v383_v32 }
 0x2e7   : > { %v382_v33 = vpop.permute.xlu1 %381 }
 0x2e8   : > { %v384_v34 = vmul.f32 %v382_v33, %v190_v1 }
 0x2ea   : > { %386 = vst [vmem:[%s188_s19 + $0x8] sm:$0xff] %v384_v34 }
 0x2eb   : > { %607 = shalt.err (!%p604_p10)
}
 0x2ec   : > { %s608_s11 = scalar_lea.hbm %s812_s28, 256  ;;  %s612_s7 = scalar_lea.hbm %s858_s3, 512 }
 0x2ed   : > { %p609_p0 = scmp.ne.s32.totalorder %s812_s28, %s608_s11  ;;  %p613_p1 = scmp.lt.s32.totalorder %s812_s28, %s858_s3 }
 0x2ee   : > { %p614_p3 = scmp.lt.s32.totalorder %s612_s7, %s608_s11 }
 0x2ef   : > { %p610_p2 = pnand %p609_p0, %p867_p12 }
 0x2f0   : > { %p615_p6 = por %p614_p3, %p613_p1 }
 0x2f1   : > { %p611_p9 = pneg %p610_p2 }
 0x2f3   : > { %p616_p11 = pnand %p615_p6, %p611_p9 }
 0x2f5   : > { %619 = shalt.err (!%p616_p11)
}
 0x2f6   : > { %s666_s17 = smov 128   ;;  %s667_s19 = smov 8  }
 0x2f7   : > { %512 = dma.vmem_to_hbm [thread:$0]  (%p867_p12), %s807_s20, 256, %s812_s28, %s388_s29, %s666_s17, %s666_s17, %s667_s19  }
 0x2f8 PF: > { %s416_s22 = sand.u32 1, %s646_s12   ;;  %p868_p13 = scmp.ne.s32.totalorder %s864_s25, 0 }
 0x2f9   : > { %p869_p4 = scmp.ge.s32.totalorder %s658_s15, 2  ;;  %s417_s26 = scalar_lea.sflag [#allocation4], %s416_s22 }
 0x2fb   : > { %p519_p5 = pnand %p869_p4, %p868_p13 }
 0x2fd   : > { %p520_p7 = pneg %p519_p5 }
 0x2ff   : > { %641 = dma.done.wait (%p520_p7), %s417_s26, 256  }
 0x300   : > { %643 = vsyncadd (%p520_p7), %s417_s26, 4294967040  ;;  %p16_p8 = scmp.ge.s32.totalorder %s713_s18, 4   ;;  %s870_s12 = smov %s650_s13 }
 0x301   : > { %s871_s13 = smov %s654_s14  ;;  %s872_s14 = smov %s725_s21 }
 0x302   : > { %s873_s15 = smov %s713_s18  ;;  %18 = sbr.rel (!%p16_p8) target bundleno = 5 (0x5), region = 77 }
 0x307   :  { %422 = vsyncpa [#allocation3], 1 }
 0x308   :  { %424 = vsyncpa [#allocation3 + $0x1], 1 }
 0x309   :  { %425 = vsyncpa [#allocation4], 1 }
 0x30a   :  { %427 = vsyncpa [#allocation4 + $0x1], 1 }

</bundles_post_ra>
